<compile_context>
chip_gen: v6e
topology: v6e:2x2x1
jax: 0.10.0
libtpu: 0.0.40
codegen_flags: <defaults>
</compile_context>

<pallas_src>
import jax
import jax.numpy as jnp
from jax.experimental import pallas as pl
from jax.experimental.pallas import tpu as pltpu


# ----------------------------------------------------------------------------
# Kernel helpers
# ----------------------------------------------------------------------------
def _im2col_rows(x, H):
    """(NB, H, C) -> (NB*H, 3*C): 3x1 height patches with per-image zero halos.

    Column layout is (dh, w, c) — dh-major — matching the stacked banded
    weight matrices from `pack_conv_weights`.  The row shifts and the SAME
    zero padding along height are folded into this single build, so the matmul
    LHS needs no per-dh sublane-offset slices.
    """
    NB, _, C = x.shape
    z = jnp.zeros((NB, 1, C), x.dtype)
    up = jnp.concatenate([z, x[:, :H - 1, :]], axis=1)   # input row h-1 (dh=0)
    dn = jnp.concatenate([x[:, 1:, :], z], axis=1)       # input row h+1 (dh=2)
    return jnp.concatenate([up, x, dn], axis=2).reshape(NB * H, 3 * C)


# ----------------------------------------------------------------------------
# Kernel: one batch chunk per grid step, both conv+BN+ReLU layers fused.
# ----------------------------------------------------------------------------
def conv_block_kernel(x_ref, w1_ref, b1_ref, w2_ref, b2_ref, o_ref):
    # x_ref:  (NB, H, W*Cin)         lane-packed input images (batch chunk)
    # w1_ref: (3*W*Cin,  W*Cout)     stacked banded conv1 weights (BN folded), bf16
    # b1_ref: (1, W*Cout)            fused conv1 bias + BN shift, f32
    # w2_ref: (3*W*Cout, W*Cout), b2_ref: (1, W*Cout)   -- same for conv2
    # o_ref:  (NB, H, W*Cout)        lane-packed output images
    NB, H, _ = x_ref.shape
    WCout = o_ref.shape[2]

    # ---- layer 1: conv1 -> BN -> ReLU : ONE MXU matmul, K = 3*W*Cin ----
    xb = x_ref[...].astype(jnp.bfloat16)                  # single cast pass
    y1 = jnp.dot(_im2col_rows(xb, H), w1_ref[...],
                 preferred_element_type=jnp.float32)      # (NB*H, W*Cout) f32
    a1 = jnp.maximum(y1 + b1_ref[...], 0.0)               # f32 epilogue

    # ---- layer 2: conv2 -> BN -> ReLU : ONE MXU matmul, K = 3*W*Cout ----
    a1b = a1.astype(jnp.bfloat16).reshape(NB, H, WCout)   # stays on-chip
    y2 = jnp.dot(_im2col_rows(a1b, H), w2_ref[...],
                 preferred_element_type=jnp.float32)
    out = jnp.maximum(y2 + b2_ref[...], 0.0)
    o_ref[...] = out.reshape(NB, H, WCout).astype(o_ref.dtype)


def _images_per_step(N, H, m_target=256):
    """Images folded into one grid step (batch -> matmul M dimension).

    Large enough M for decent MXU fill (target ~256 rows), but keep >= 2 grid
    steps whenever N >= 2 so v7x's two TensorCores both get work on the
    'parallel' axis (single-TC v5e/v6e are indifferent).  Result divides N.
    """
    cap = max(1, m_target // max(H, 1))
    if N >= 2:
        cap = min(cap, max(1, N // 2))
    nb = 1
    for d in range(1, min(cap, N) + 1):
        if N % d == 0:
            nb = d
    return nb


def conv_block(x_packed, w1, b1, w2, b2, *, H, W, Cout, images_per_step=None):
    """Fused (conv3x3 + BN + ReLU) x2 on lane-packed activations (N, H, W*C)."""
    N, _, WCin = x_packed.shape
    WCout = W * Cout
    nb = images_per_step or _images_per_step(N, H)
    assert N % nb == 0, "images_per_step must divide the batch"
    # NOTE: weight/bias index_maps are constant, so their blocks stay resident
    # across grid steps; pl.Buffered(1) would halve their (tiny) double-buffered
    # VMEM footprint but is skipped as negligible at this size.
    return pl.pallas_call(
        conv_block_kernel,
        out_shape=jax.ShapeDtypeStruct((N, H, WCout), jnp.float32),
        grid=(N // nb,),
        in_specs=[
            pl.BlockSpec((nb, H, WCin), lambda i: (i, 0, 0)),
            pl.BlockSpec((3 * WCin, WCout), lambda i: (0, 0)),
            pl.BlockSpec((1, WCout), lambda i: (0, 0)),
            pl.BlockSpec((3 * WCout, WCout), lambda i: (0, 0)),
            pl.BlockSpec((1, WCout), lambda i: (0, 0)),
        ],
        out_specs=pl.BlockSpec((nb, H, WCout), lambda i: (i, 0, 0)),
        compiler_params=pltpu.CompilerParams(
            dimension_semantics=("parallel",),
            vmem_limit_bytes=32 * 1024 * 1024),
    )(x_packed, w1, b1, w2, b2)


# ----------------------------------------------------------------------------
# Weight repacking: fold eval-mode BN + conv bias, build stacked banded matrix.
# (Function of the parameters only — done once per call outside the kernel.)
# ----------------------------------------------------------------------------
def pack_conv_weights(w_oihw, conv_bias, gamma, beta, mean, var, W, eps=1e-5):
    Cout, Cin = w_oihw.shape[0], w_oihw.shape[1]
    scale = gamma / jnp.sqrt(var + eps)                       # (Cout,)
    bias = conv_bias * scale + (beta - mean * scale)          # (Cout,)
    # OIHW -> HWIO, fold the BN scale into the output-channel axis.
    w = jnp.transpose(w_oihw, (2, 3, 1, 0)) * scale           # (3,3,Cin,Cout)
    # Banded selector: T[wi, dw, wo] = 1 iff wi == wo + dw - 1
    # (also encodes SAME zero-padding along the width axis).
    wi = jnp.arange(W)[:, None, None]
    dw = jnp.arange(3)[None, :, None]
    wo = jnp.arange(W)[None, None, :]
    T = (wi == wo + dw - 1).astype(w.dtype)                   # (W, 3, W)
    m = jnp.einsum('ido,hdck->hicok', T, w)                   # (3, W, Cin, W, Cout)
    # Stack the three kernel-height slabs along K (dh-major), matching the
    # (dh, w, c) column layout of the in-kernel im2col LHS.
    m = m.reshape(3 * W * Cin, W * Cout).astype(jnp.bfloat16)
    b = jnp.tile(bias, W).reshape(1, W * Cout).astype(jnp.float32)
    return m, b


# ----------------------------------------------------------------------------
# Module wrapper (PyTorch `Conv`, eval mode).
# ----------------------------------------------------------------------------
class ConvPallas:
    def __init__(self, ins, outs, key):
        k1, k2, k3, k4, kg, kb, km, kv = jax.random.split(key, 8)
        # Conv2d(ins, outs, 3, padding=1) / Conv2d(outs, outs, 3, padding=1)
        self.w1 = 0.1 * jax.random.normal(k1, (outs, ins, 3, 3), jnp.float32)
        self.b1 = 0.1 * jax.random.normal(k2, (outs,), jnp.float32)
        self.w2 = 0.1 * jax.random.normal(k3, (outs, outs, 3, 3), jnp.float32)
        self.b2 = 0.1 * jax.random.normal(k4, (outs,), jnp.float32)
        # Single shared BatchNorm2d(outs) applied after both convs, exactly
        # like `self.norm` in the PyTorch module (eval mode, running stats).
        self.gamma = 1.0 + 0.1 * jax.random.normal(kg, (outs,), jnp.float32)
        self.beta = 0.1 * jax.random.normal(kb, (outs,), jnp.float32)
        self.running_mean = 0.1 * jax.random.normal(km, (outs,), jnp.float32)
        self.running_var = 1.0 + 0.1 * jax.random.uniform(kv, (outs,),
                                                          jnp.float32)
        self.ins, self.outs = ins, outs

    def __call__(self, x_nchw):
        N, _, H, W = x_nchw.shape
        Cout = self.outs
        m1, fb1 = pack_conv_weights(self.w1, self.b1, self.gamma, self.beta,
                                    self.running_mean, self.running_var, W)
        m2, fb2 = pack_conv_weights(self.w2, self.b2, self.gamma, self.beta,
                                    self.running_mean, self.running_var, W)
        # Single transpose in / out to keep the PyTorch NCHW interface; the
        # kernel itself works on lane-packed (N, H, W*C) activations.
        x = jnp.transpose(x_nchw, (0, 2, 3, 1)).reshape(N, H, W * self.ins)
        out = conv_block(x, m1, fb1, m2, fb2, H=H, W=W, Cout=Cout)
        out = out.reshape(N, H, W, Cout)
        return jnp.transpose(out, (0, 3, 1, 2))


# ----------------------------------------------------------------------------
# Pure-JAX reference (f32) for correctness.
# ----------------------------------------------------------------------------
def reference_forward(x, model, eps=1e-5):
    scale = model.gamma / jnp.sqrt(model.running_var + eps)
    shift = model.beta - model.running_mean * scale

    def conv(inp, w, b):
        y = jax.lax.conv_general_dilated(
            inp, w, window_strides=(1, 1), padding='SAME',
            dimension_numbers=('NCHW', 'OIHW', 'NCHW'),
            precision=jax.lax.Precision.HIGHEST)
        return y + b[None, :, None, None]

    def bn(y):
        return y * scale[None, :, None, None] + shift[None, :, None, None]

    o = jnp.maximum(bn(conv(x, model.w1, model.b1)), 0.0)
    o = jnp.maximum(bn(conv(o, model.w2, model.b2)), 0.0)
    return o


if __name__ == "__main__":
    key = jax.random.PRNGKey(0)
    k_x, k_p, k_x2 = jax.random.split(key, 3)

    # Small shapes consistent with the module: batch=2, ins=4, outs=8, 16x16.
    N, CIN, COUT, H, W = 2, 4, 8, 16, 16
    x = jax.random.normal(k_x, (N, CIN, H, W), jnp.float32)   # NCHW like torch

    model = ConvPallas(CIN, COUT, k_p)
    out = jax.block_until_ready(model(x))

    assert out.shape == (N, COUT, H, W)
    assert bool(jnp.all(jnp.isfinite(out)))
    ref = reference_forward(x, model)
    err = float(jnp.max(jnp.abs(out - ref)))
    assert err < 5e-2, f"max abs err {err}"

    # Also exercise the batched-M path (several images folded into one grid
    # step's matmul M dimension) with a larger batch.
    N2 = 8
    x2 = jax.random.normal(k_x2, (N2, CIN, H, W), jnp.float32)
    out2 = jax.block_until_ready(model(x2))
    ref2 = reference_forward(x2, model)
    err2 = float(jnp.max(jnp.abs(out2 - ref2)))
    assert err2 < 5e-2, f"max abs err {err2}"

    print("KERNEL_OK")
</pallas_src>

<mosaic_0001>
module attributes {stable_mosaic.version = 11 : i64} {
  func.func @conv_block_kernel(%arg0: i32, %arg1: memref<1x16x64xf32, #tpu.memory_space<vmem>>, %arg2: memref<192x128xbf16, #tpu.memory_space<vmem>>, %arg3: memref<1x128xf32, #tpu.memory_space<vmem>>, %arg4: memref<384x128xbf16, #tpu.memory_space<vmem>>, %arg5: memref<1x128xf32, #tpu.memory_space<vmem>>, %arg6: memref<1x16x128xf32, #tpu.memory_space<vmem>>) attributes {dimension_semantics = [#tpu.dimension_semantics<parallel>], iteration_bounds = array<i64: 2>, scalar_prefetch = 0 : i64, scratch_operands = 0 : i64, tpu.core_type = #tpu.core_type<tc>, window_params = [{transform_indices = @transform_0, window_bounds = array<i64: 1, 16, 64>}, {pipeline_mode = #tpu.pipeline_mode<synchronous>, transform_indices = @transform_1, window_bounds = array<i64: 192, 128>}, {pipeline_mode = #tpu.pipeline_mode<synchronous>, transform_indices = @transform_2, window_bounds = array<i64: 1, 128>}, {pipeline_mode = #tpu.pipeline_mode<synchronous>, transform_indices = @transform_3, window_bounds = array<i64: 384, 128>}, {pipeline_mode = #tpu.pipeline_mode<synchronous>, transform_indices = @transform_4, window_bounds = array<i64: 1, 128>}, {transform_indices = @transform_5, window_bounds = array<i64: 1, 16, 128>}]} {
    %c0 = arith.constant 0 : index
    %c0_0 = arith.constant 0 : index
    %c0_1 = arith.constant 0 : index
    %0 = vector.load %arg1[%c0, %c0_0, %c0_1] : memref<1x16x64xf32, #tpu.memory_space<vmem>>, vector<1x16x64xf32>
    %1 = arith.truncf %0 : vector<1x16x64xf32> to vector<1x16x64xbf16>
    %cst = arith.constant 0.000000e+00 : bf16
    %2 = vector.broadcast %cst : bf16 to vector<1x1x64xbf16>
    %3 = vector.extract_strided_slice %1 {offsets = [0, 0, 0], sizes = [1, 15, 64], strides = [1, 1, 1]} : vector<1x16x64xbf16> to vector<1x15x64xbf16>
    %4 = tpu.concatenate %2, %3 in 1 : vector<1x1x64xbf16>, vector<1x15x64xbf16> -> vector<1x16x64xbf16>
    %5 = vector.extract_strided_slice %1 {offsets = [0, 1, 0], sizes = [1, 15, 64], strides = [1, 1, 1]} : vector<1x16x64xbf16> to vector<1x15x64xbf16>
    %6 = tpu.concatenate %5, %2 in 1 : vector<1x15x64xbf16>, vector<1x1x64xbf16> -> vector<1x16x64xbf16>
    %7 = tpu.concatenate %4, %1, %6 in 2 : vector<1x16x64xbf16>, vector<1x16x64xbf16>, vector<1x16x64xbf16> -> vector<1x16x192xbf16>
    %8 = vector.shape_cast %7 : vector<1x16x192xbf16> to vector<16x192xbf16>
    %c0_2 = arith.constant 0 : index
    %c0_3 = arith.constant 0 : index
    %9 = vector.load %arg2[%c0_2, %c0_3] : memref<192x128xbf16, #tpu.memory_space<vmem>>, vector<192x128xbf16>
    %cst_4 = arith.constant dense<0.000000e+00> : vector<16x128xf32>
    %10 = tpu.matmul %8, %9, %cst_4 {dimension_numbers = #tpu.dot_dimension_numbers<[1], [0], [0], [1], [0, 0, 1, 1], [], []>} : vector<16x192xbf16>, vector<192x128xbf16>, vector<16x128xf32> -> vector<16x128xf32>
    %c0_5 = arith.constant 0 : index
    %c0_6 = arith.constant 0 : index
    %11 = vector.load %arg3[%c0_5, %c0_6] : memref<1x128xf32, #tpu.memory_space<vmem>>, vector<1x128xf32>
    %12 = vector.broadcast %11 : vector<1x128xf32> to vector<16x128xf32>
    %13 = arith.addf %10, %12 : vector<16x128xf32>
    %cst_7 = arith.constant 0.000000e+00 : f32
    %14 = vector.broadcast %cst_7 : f32 to vector<16x128xf32>
    %15 = arith.maximumf %13, %14 : vector<16x128xf32>
    %16 = arith.truncf %15 : vector<16x128xf32> to vector<16x128xbf16>
    %17 = vector.shape_cast %16 : vector<16x128xbf16> to vector<1x16x128xbf16>
    %cst_8 = arith.constant 0.000000e+00 : bf16
    %18 = vector.broadcast %cst_8 : bf16 to vector<1x1x128xbf16>
    %19 = vector.extract_strided_slice %17 {offsets = [0, 0, 0], sizes = [1, 15, 128], strides = [1, 1, 1]} : vector<1x16x128xbf16> to vector<1x15x128xbf16>
    %20 = tpu.concatenate %18, %19 in 1 : vector<1x1x128xbf16>, vector<1x15x128xbf16> -> vector<1x16x128xbf16>
    %21 = vector.extract_strided_slice %17 {offsets = [0, 1, 0], sizes = [1, 15, 128], strides = [1, 1, 1]} : vector<1x16x128xbf16> to vector<1x15x128xbf16>
    %22 = tpu.concatenate %21, %18 in 1 : vector<1x15x128xbf16>, vector<1x1x128xbf16> -> vector<1x16x128xbf16>
    %23 = tpu.concatenate %20, %17, %22 in 2 : vector<1x16x128xbf16>, vector<1x16x128xbf16>, vector<1x16x128xbf16> -> vector<1x16x384xbf16>
    %24 = vector.shape_cast %23 : vector<1x16x384xbf16> to vector<16x384xbf16>
    %c0_9 = arith.constant 0 : index
    %c0_10 = arith.constant 0 : index
    %25 = vector.load %arg4[%c0_9, %c0_10] : memref<384x128xbf16, #tpu.memory_space<vmem>>, vector<384x128xbf16>
    %cst_11 = arith.constant dense<0.000000e+00> : vector<16x128xf32>
    %26 = tpu.matmul %24, %25, %cst_11 {dimension_numbers = #tpu.dot_dimension_numbers<[1], [0], [0], [1], [0, 0, 1, 1], [], []>} : vector<16x384xbf16>, vector<384x128xbf16>, vector<16x128xf32> -> vector<16x128xf32>
    %c0_12 = arith.constant 0 : index
    %c0_13 = arith.constant 0 : index
    %27 = vector.load %arg5[%c0_12, %c0_13] : memref<1x128xf32, #tpu.memory_space<vmem>>, vector<1x128xf32>
    %28 = vector.broadcast %27 : vector<1x128xf32> to vector<16x128xf32>
    %29 = arith.addf %26, %28 : vector<16x128xf32>
    %cst_14 = arith.constant 0.000000e+00 : f32
    %30 = vector.broadcast %cst_14 : f32 to vector<16x128xf32>
    %31 = arith.maximumf %29, %30 : vector<16x128xf32>
    %32 = vector.shape_cast %31 : vector<16x128xf32> to vector<1x16x128xf32>
    %c0_15 = arith.constant 0 : index
    %c0_16 = arith.constant 0 : index
    %c0_17 = arith.constant 0 : index
    %33 = vector.load %arg6[%c0_15, %c0_16, %c0_17] : memref<1x16x128xf32, #tpu.memory_space<vmem>>, vector<1x16x128xf32>
    tpu.vector_store %arg6[%c0_15, %c0_16, %c0_17], %32 {strides = array<i32>} : memref<1x16x128xf32, #tpu.memory_space<vmem>>, vector<1x16x128xf32>,
    return
  }
  func.func @transform_0(%arg0: i32) -> (i32, i32, i32) {
    %c0_i32 = arith.constant 0 : i32
    %c0_i32_0 = arith.constant 0 : i32
    %c0_i32_1 = arith.constant 0 : i32
    return %arg0, %c0_i32, %c0_i32_0 : i32, i32, i32
  }
  func.func @transform_1(%arg0: i32) -> (i32, i32) {
    %c0_i32 = arith.constant 0 : i32
    %c0_i32_0 = arith.constant 0 : i32
    %c0_i32_1 = arith.constant 0 : i32
    return %c0_i32, %c0_i32_0 : i32, i32
  }
  func.func @transform_2(%arg0: i32) -> (i32, i32) {
    %c0_i32 = arith.constant 0 : i32
    %c0_i32_0 = arith.constant 0 : i32
    %c0_i32_1 = arith.constant 0 : i32
    return %c0_i32, %c0_i32_0 : i32, i32
  }
  func.func @transform_3(%arg0: i32) -> (i32, i32) {
    %c0_i32 = arith.constant 0 : i32
    %c0_i32_0 = arith.constant 0 : i32
    %c0_i32_1 = arith.constant 0 : i32
    return %c0_i32, %c0_i32_0 : i32, i32
  }
  func.func @transform_4(%arg0: i32) -> (i32, i32) {
    %c0_i32 = arith.constant 0 : i32
    %c0_i32_0 = arith.constant 0 : i32
    %c0_i32_1 = arith.constant 0 : i32
    return %c0_i32, %c0_i32_0 : i32, i32
  }
  func.func @transform_5(%arg0: i32) -> (i32, i32, i32) {
    %c0_i32 = arith.constant 0 : i32
    %c0_i32_0 = arith.constant 0 : i32
    %c0_i32_1 = arith.constant 0 : i32
    return %arg0, %c0_i32, %c0_i32_0 : i32, i32, i32
  }
}

</mosaic_0001>

<bundles_post_ra>
// kernel: tpu_custom_call.1
= control target key start
LH: loop header
LB: loop body
LE: loop exit
PB: predicated region body
PF: predicated region fallthrough
CT: control target
= control target key end

     0   :  { %10 = vsyncpa [#allocation3], 0  ;;  %s1502_s0 = inlined_call_operand.hbm [shape: f32[2,16,64], index: 0, kind: input, shape index: {}]   ;;  %s1503_s1 = inlined_call_operand.hbm [shape: bf16[192,128], index: 1, kind: input, shape index: {}]   ;;  %s1504_s2 = inlined_call_operand.vmem [shape: f32[1,128], index: 2, kind: input, shape index: {}]   ;;  %s1505_s3 = inlined_call_operand.hbm [shape: bf16[384,128], index: 3, kind: input, shape index: {}]   ;;  %s1506_s4 = inlined_call_operand.vmem [shape: f32[1,128], index: 4, kind: input, shape index: {}]   ;;  %s1507_s5 = inlined_call_operand.hbm [shape: f32[2,16,128], index: 5, kind: output, shape index: {}]  }
   0x1   :  { %12 = vsyncpa [#allocation3 + $0x1], 0 }
   0x2   :  { %13 = vsyncpa [#allocation6], 0 }
   0x3   :  { %14 = vsyncpa [#allocation4], 0 }
   0x4   :  { %16 = vsyncpa [#allocation4 + $0x1], 0  ;;  %s1274_s18 = smov 0   ;;  %s1276_s19 = smov 0  }
   0x5   :  { %s1278_s20 = smov 0   ;;  %s1280_s21 = smov 0  }
   0x6 LB: > { %s1295_s22 = sadd.s32 4294967295, %s1228_s21   ;;  %s857_s23 = sadd.s32 4294967294, %s1228_s21   ;;  %s1228_s21 = sphi %s1280_s21, %s1533_s21   ;;  %s1224_s20 = sphi %s1278_s20, %s1532_s20   ;;  %s1220_s19 = sphi %s1276_s19, %s1531_s19   ;;  %s1216_s18 = sphi %s1274_s18, %s1530_s18  }
   0x7   : > { %p42_p0 = scmp.ne.s32.totalorder %s1220_s19, %s1216_s18  ;;  %p1508_p1 = scmp.eq.s32.totalorder %s1295_s22, 0 }
   0x8   : > { %p156_p3 = scmp.eq.s32.totalorder %s857_s23, 1  ;;  %p858_p5 = scmp.ge.s32.totalorder %s1228_s21, 1 }
   0x9   : > { %p1304_p4 = por %p1508_p1, %p42_p0  ;;  %p163_p7 = scmp.lt.s32.totalorder %s1228_s21, 3 }
   0xa   : > { %p1309_p6 = por %p156_p3, %p42_p0  ;;  %s1230_s27 = smov [#allocation5]  }
   0xb   : > { %s1512_s24 = scalar_select %p1304_p4, 1, 0 }
   0xc   : > { %s1513_s25 = scalar_select %p1309_p6, 1, 0 }
   0xd   : > { %p1314_p8 = pnand %p858_p5, %p163_p7  ;;  %s175_s28 = sshll.u32 %s1230_s27, 4  ;;  %s176_s28 = int_to_ptr.vmem [resolvable:$true] %s175_s28 }
   0xe   : > { %s1231_s30 = smov [#allocation7]   ;;  %s1091_s7 = scalar_lea.vmem %s176_s28, 1536 }
   0xf   : > { %s1514_s26 = scalar_select %p1314_p8, 1, 0 }
  0x10   : > { %p979_p9 = pneg %p1314_p8  ;;  %s191_s6 = sshll.u32 %s1231_s30, 4  ;;  %s192_s6 = int_to_ptr.vmem [resolvable:$true] %s191_s6 }
  0x11   : > { %p1092_p13 = scmp.ne.s32.totalorder %s176_s28, %s1091_s7  ;;  %p1099_p5 = scmp.lt.s32.totalorder %s176_s28, %s176_s28 }
  0x12   : > { %p1323_p11 = pnand %p979_p9, %p1508_p1  ;;  %p1100_p7 = scmp.lt.s32.totalorder %s1091_s7, %s1091_s7 }
  0x14   : > { %p1082_p12 = pneg %p1323_p11  ;;  %p1101_p10 = por %p1100_p7, %p1099_p5 }
  0x16   : > { %p1094_p0 = pnand %p1092_p13, %p1082_p12 }
  0x18   : > { %p1095_p3 = pneg %p1094_p0 }
  0x1a   : > { %p1102_p9 = pnand %p1101_p10, %p1095_p3 }
  0x1c   : > { %1105 = shalt.err (!%p1102_p9)
}
  0x1d   : > { %s1232_s8 = smov 64   ;;  %s1233_s9 = smov 4  }
  0x1e   : > { %982 = dma.hbm_to_vmem [thread:$0]  (!%p1323_p11), %s1503_s1, 1536, %s176_s28, [#allocation6], %s1232_s8, %s1232_s8, %s1233_s9  }
  0x1f   : > { %s1117_s12 = scalar_lea.vmem %s192_s6, 3072  ;;  %p1125_p2 = scmp.lt.s32.totalorder %s192_s6, %s192_s6 }
  0x20   : > { %p1118_p1 = scmp.ne.s32.totalorder %s192_s6, %s1117_s12  ;;  %p1126_p6 = scmp.lt.s32.totalorder %s1117_s12, %s1117_s12 }
  0x22   : > { %p1120_p13 = pnand %p1118_p1, %p1082_p12  ;;  %p1127_p5 = por %p1126_p6, %p1125_p2 }
  0x24   : > { %p1121_p0 = pneg %p1120_p13 }
  0x26   : > { %p1128_p10 = pnand %p1127_p5, %p1121_p0 }
  0x28   : > { %1131 = shalt.err (!%p1128_p10)
}
  0x29   : > { %985 = dma.hbm_to_vmem [thread:$0]  (!%p1323_p11), %s1505_s3, 3072, %s192_s6, [#allocation6], %s1232_s8, %s1232_s8, %s1233_s9  }
  0x2a   : > { %s1346_s15 = sadd.s32 1, %s1228_s21   ;;  %s29_s16 = sadd.s32 1, %s1224_s20 }
  0x2b   : > { %s26_s17 = ssub.s32 %s1228_s21, %s1346_s15  ;;  %p36_p1 = scmp.ne.s32.totalorder %s1224_s20, %s1220_s19 }
  0x2c   : > { %p27_p2 = scmp.eq.s32.totalorder %s26_s17, 0  ;;  %p37_p6 = scmp.eq.s32.totalorder %s1228_s21, 0 }
  0x2d   : > { %p1516_p12 = scmp.eq.s32.totalorder %s1295_s22, 1  ;;  %p996_p7 = scmp.lt.s32.totalorder %s1228_s21, 2 }
  0x2e   : > { %s1362_s27 = scalar_select %p27_p2, %s1224_s20, %s29_s16  }
  0x2f   : > { %p1356_p3 = por %p1516_p12, %p36_p1  ;;  %p38_p9 = por %p37_p6, %p36_p1 }
  0x30   : > { %s208_s28 = sand.u32 1, %s1224_s20   ;;  %s914_s30 = sshll.u32 %s1228_s21, 8 }
  0x31   : > { %s1517_s23 = scalar_select %p1356_p3, 1, 0 }
  0x32   : > { %s862_s29 = sshll.u32 %s208_s28, 4  ;;  %s1369_s8 = scalar_lea.hbm %s1502_s0, %s914_s30 }
  0x33   : > { %s212_s9 = scalar_lea.vmem [#allocation2], %s862_s29  ;;  %p1373_p11 = pnand %p996_p7, %p38_p9 }
  0x34   : > { %s219_s10 = sshll.u32 %s212_s9, 4  ;;  %s1377_s12 = scalar_lea.sflag [#allocation3], %s208_s28  ;;  %s1371_s10 = int_to_ptr.vmem [resolvable:$true] %s219_s10 }
  0x35   : > { %s1132_s13 = scalar_lea.hbm %s1369_s8, 256  ;;  %p1134_p0 = pneg %p1373_p11 }
  0x36   : > { %p1133_p13 = scmp.ne.s32.totalorder %s1369_s8, %s1132_s13  ;;  %s1137_s17 = scalar_lea.hbm %s1502_s0, 512 }
  0x37   : > { %p1138_p1 = scmp.lt.s32.totalorder %s1369_s8, %s1502_s0  ;;  %p1139_p2 = scmp.lt.s32.totalorder %s1137_s17, %s1132_s13 }
  0x38   : > { %p1135_p5 = pnand %p1134_p0, %p1133_p13 }
  0x39   : > { %p1140_p6 = por %p1139_p2, %p1138_p1 }
  0x3a   : > { %p1136_p10 = pneg %p1135_p5 }
  0x3c   : > { %p1141_p12 = pnand %p1140_p6, %p1136_p10 }
  0x3e   : > { %1144 = shalt.err (!%p1141_p12)
}
  0x3f   : > { %s1145_s28 = scalar_lea.vmem %s1371_s10, 256  ;;  %s1234_s6 = smov [#allocation2]  }
  0x40   : > { %p1146_p7 = scmp.ne.s32.totalorder %s1371_s10, %s1145_s28  ;;  %s1150_s7 = sshll.u32 %s1234_s6, 4  ;;  %s1151_s7 = int_to_ptr.vmem [resolvable:$false] %s1150_s7 }
  0x41   : > { %s1152_s9 = scalar_lea.vmem %s1151_s7, 512  ;;  %p1153_p5 = scmp.lt.s32.totalorder %s1371_s10, %s1151_s7 }
  0x42   : > { %p1148_p9 = pnand %p1146_p7, %p1134_p0  ;;  %p1154_p3 = scmp.lt.s32.totalorder %s1152_s9, %s1145_s28 }
  0x44   : > { %p1149_p13 = pneg %p1148_p9  ;;  %p1155_p4 = por %p1154_p3, %p1153_p5 }
  0x46   : > { %p1156_p8 = pnand %p1155_p4, %p1149_p13 }
  0x48   : > { %1159 = shalt.err (!%p1156_p8)
}
  0x49   : > { %s1235_s13 = smov 128   ;;  %s1236_s14 = smov 8  }
  0x4a   : > { %989 = dma.hbm_to_vmem [thread:$0]  (!%p1373_p11), %s1369_s8, 256, %s1371_s10, %s1377_s12, %s1235_s13, %s1235_s13, %s1236_s14  }
  0x4b   : > { %p1519_p0 = scmp.ne.s32.totalorder %s1514_s26, 0 }
  0x4c   : > { %s1401_s16 = sand.u32 (!%p1519_p0), 1, %s1220_s19   ;;  %p1520_p4 = scmp.ne.s32.totalorder (!%p1519_p0), %s1512_s24, 0 }
  0x4d   : > { %231 = sbr.rel (%p1519_p0) target bundleno = 662 (0x296), region = 40  ;;  %s866_s17 = sshll.u32 (!%p1519_p0), %s1401_s16, 4 }
  0x4e   : > { %s234_s29 = scalar_lea.sflag (!%p1519_p0), [#allocation3], %s1401_s16  ;;  %s237_s30 = scalar_lea.vmem (!%p1519_p0), [#allocation2], %s866_s17 }
  0x52   : > { %1203 = dma.done.wait (%p1520_p4), %s234_s29, 256  }
  0x53   : > { %1205 = vsyncadd (%p1520_p4), %s234_s29, 4294967040  ;;  %p1521_p8 = scmp.eq.s32.totalorder %s1295_s22, 0 }
  0x55   : > { %1207 = dma.done.wait (%p1521_p8), [#allocation6], 4608   ;;  %p1522_p3 = pmov %p1521_p8 }
  0x56   : > { %v1237_v0 = vmov 0   ;;  %v273_v1 = vld [vmem:[%s237_s30] sm:$0xff]  ;;  %v274_v2 = vld [vmem:[%s237_s30 + $0x8] sm:$0xff]  ;;  %vm291_vm0 = vcmask 1047552   ;;  %vm292_vm1 = vsmask.f32 7424 }
  0x57   : > { %1209 = vsyncadd (%p1522_p3), [#allocation6], 4294962688  ;;  %409 = vmatprep.subr.bf16.mxu0 %v1237_v0  ;;  %v275_v3 = vpack.c.bf16 %v274_v2, %v273_v1  ;;  %v1044_v4 = vld [vmem:[#allocation5 + $0x38] sm:$0xff]   ;;  %s1238_s26 = smov 64   ;;  %v1045_v5 = vld [vmem:[#allocation5 + $0x30] sm:$0xff]   ;;  %vm298_vm3 = vcmask 523264  }
  0x58   : > { %410 = vmatpush1.bf16.msra.mxu0 %v1044_v4  ;;  %vm1417_vm2 = vmand %vm291_vm0, %vm292_vm1  ;;  %v1046_v11 = vld [vmem:[#allocation5 + $0x28] sm:$0xff]   ;;  %v1047_v15 = vld [vmem:[#allocation5 + $0x20] sm:$0xff]   ;;  %vm284_vm4 = vcmask 1040384   ;;  %vm285_vm5 = vsmask.f32 256  ;;  %v1239_v44 = vmov 0.0  }
  0x59   : > { %296 = vrot.lane.b32.xlu0 %v275_v3, %s1238_s26  ;;  %v277_v6 = vshrl.u32 %v275_v3, 16  ;;  %411 = vmatprep.subr.bf16.mxu0 %v1237_v0  ;;  %v280_v7 = vshll.u32 %v275_v3, 16  ;;  %v1048_v16 = vld [vmem:[#allocation5 + $0x18] sm:$0xff]   ;;  %v1058_v19 = vld [vmem:[#allocation7 + $0x70] sm:$0xff]   ;;  %v1060_v21 = vld [vmem:[#allocation7 + $0x68] sm:$0xff]   ;;  %vm1240_vm7 = vmmov 0  }
  0x5a   : > { %v1056_v17 = vld [vmem:[#allocation7 + $0x78] sm:$0xff]   ;;  %v1059_v20 = vld [vmem:[#allocation7 + $0x30] sm:$0xff]   ;;  %v1061_v23 = vld [vmem:[#allocation7 + $0x28] sm:$0xff]   ;;  %s271_s12 = scalar_lea.vmem [#allocation8], %s866_s17  ;;  %s915_s6 = sshll.u32 %s1295_s22, 8 }
  0x5b   : > { %v279_v8 = vrot.slane %v277_v6, 7  ;;  %v288_v9 = vrot.slane %v280_v7, 1  ;;  %v1057_v18 = vld [vmem:[#allocation7 + $0x38] sm:$0xff]   ;;  %916 = vmatprep.subr.bf16.mxu1 %v1056_v17  ;;  %v1049_v22 = vld [vmem:[#allocation5 + $0x10] sm:$0xff]   ;;  %v1062_v24 = vld [vmem:[#allocation7 + $0x60] sm:$0xff]   ;;  %s765_s28 = sshll.u32 %s271_s12, 4  ;;  %s1459_s13 = scalar_lea.hbm %s1507_s5, %s915_s6  ;;  %s1454_s28 = int_to_ptr.vmem [resolvable:$true] %s765_s28 }
  0x5c   : > { %412 = vmatpush1.bf16.msra.mxu0 %v1045_v5  ;;  %917 = vmatpush3.bf16.msra.mxu1 %v1057_v18  ;;  %v1050_v25 = vld [vmem:[#allocation5 + $0x8] sm:$0xff]   ;;  %v1063_v26 = vld [vmem:[#allocation7 + $0x20] sm:$0xff]   ;;  %v1052_v28 = vld [vmem:[#allocation5 + $0x58] sm:$0xff]   ;;  %s752_s14 = scalar_lea.sflag [#allocation4], %s1401_s16  ;;  %s1160_s17 = scalar_lea.vmem %s1454_s28, 256 }
  0x5d   : > { %v282_v12 = vor.u32 %v280_v7, %v279_v8  ;;  %413 = vmatprep.subr.bf16.mxu0 %v1237_v0  ;;  %v289_v13 = vor.u32 %v288_v9, %v277_v6  ;;  %918 = vmatprep.subr.bf16.mxu1 %v1058_v19  ;;  %v1051_v27 = vld [vmem:[#allocation5] sm:$0xff]   ;;  %v1053_v29 = vld [vmem:[#allocation5 + $0x50] sm:$0xff]   ;;  %v1054_v30 = vld [vmem:[#allocation5 + $0x48] sm:$0xff]   ;;  %p1161_p11 = scmp.ne.s32.totalorder %s1454_s28, %s1160_s17  ;;  %p1527_p10 = scmp.ne.s32.totalorder %s1517_s23, 0 }
  0x5e   : > { %v1055_v31 = vld [vmem:[#allocation5 + $0x40] sm:$0xff]   ;;  %vm1434_vm6 = vmand %vm284_vm4, %vm285_vm5  ;;  %v1064_v36 = vld [vmem:[#allocation7 + $0x58] sm:$0xff]   ;;  %s1241_s22 = smov [#allocation8]  }
  0x5f   : > { %v294_v14 = vsel %vm1417_vm2, %v289_v13, 0  ;;  %v287_v33 = vsel %vm1434_vm6, 0, %v282_v12  ;;  %v1065_v37 = vld [vmem:[#allocation7 + $0x18] sm:$0xff]   ;;  %v1066_v38 = vld [vmem:[#allocation7 + $0x50] sm:$0xff]   ;;  %v1068_v40 = vld [vmem:[#allocation7 + $0x48] sm:$0xff]   ;;  %p1162_p1 = pnand %p1161_p11, %p1527_p10  ;;  %s1164_s29 = sshll.u32 %s1241_s22, 4  ;;  %s1165_s29 = int_to_ptr.vmem [resolvable:$false] %s1164_s29 }
  0x60   : > { %414 = vmatpush1.bf16.msra.mxu0 %v1046_v11  ;;  %883 = vmatprep.mubr.msk.bf16.mxu0 %vm298_vm3, %v294_v14  ;;  %v1067_v39 = vld [vmem:[#allocation7 + $0x10] sm:$0xff]   ;;  %v1069_v41 = vld [vmem:[#allocation7 + $0x8] sm:$0xff]   ;;  %v1070_v42 = vld [vmem:[#allocation7 + $0x40] sm:$0xff]   ;;  %s1166_s30 = scalar_lea.vmem %s1165_s29, 512  ;;  %p1167_p6 = scmp.lt.s32.totalorder %s1454_s28, %s1165_s29 }
  0x61   : > { %415 = vmatprep.subr.bf16.mxu0 %v1237_v0  ;;  %919 = vmatpush3.bf16.msra.mxu1 %v1059_v20  ;;  %v1071_v43 = vld [vmem:[#allocation7] sm:$0xff]   ;;  %v1072_v59 = vld [vmem:[#allocation7 + $0xb8] sm:$0xff]   ;;  %v1073_v61 = vld [vmem:[#allocation7 + $0xb0] sm:$0xff]   ;;  %p1163_p2 = pneg %p1162_p1  ;;  %p1168_p12 = scmp.lt.s32.totalorder %s1166_s30, %s1160_s17 }
  0x62   : > { %920 = vmatprep.subr.bf16.mxu1 %v1060_v21  ;;  %v870_v45 = vld [vmem:[%s1504_s2] ss:$0 sm:$0xff]  ;;  %v1074_v62 = vld [vmem:[#allocation7 + $0xa8] sm:$0xff]   ;;  %v1077_v1 = vld [vmem:[#allocation7 + $0x90] sm:$0xff]  }
  0x63   : > { %v1075_v63 = vld [vmem:[#allocation7 + $0xa0] sm:$0xff]   ;;  %v1078_v2 = vld [vmem:[#allocation7 + $0x88] sm:$0xff]   ;;  %p1169_p7 = por %p1168_p12, %p1167_p6 }
  0x64   : > { %416 = vmatpush1.bf16.msra.mxu0 %v1047_v15  ;;  %v1079_v4 = vld [vmem:[#allocation7 + $0x80] sm:$0xff]  }
  0x65   : > { %417 = vmatprep.subr.bf16.mxu0 %v1237_v0  ;;  %921 = vmatpush3.bf16.msra.mxu1 %v1061_v23  ;;  %v884_v13 = vld [vmem:[%s1506_s4] ss:$0 sm:$0xff]  ;;  %p1170_p9 = pnand %p1169_p7, %p1163_p2 }
  0x66   : > { %922 = vmatprep.subr.bf16.mxu1 %v1062_v24 }
  0x68   : > { %418 = vmatpush1.bf16.msra.mxu0 %v1048_v16 }
  0x69   : > { %419 = vmatprep.subr.bf16.mxu0 %v1237_v0  ;;  %923 = vmatpush3.bf16.msra.mxu1 %v1063_v26 }
  0x6a   : > { %924 = vmatprep.subr.bf16.mxu1 %v1064_v36 }
  0x6c   : > { %420 = vmatpush1.bf16.msra.mxu0 %v1049_v22 }
  0x6d   : > { %421 = vmatprep.subr.bf16.mxu0 %v1237_v0  ;;  %925 = vmatpush3.bf16.msra.mxu1 %v1065_v37 }
  0x6e   : > { %926 = vmatprep.subr.bf16.mxu1 %v1066_v38 }
  0x70   : > { %422 = vmatpush1.bf16.msra.mxu0 %v1050_v25 }
  0x71   : > { %423 = vmatprep.subr.bf16.mxu0 %v1237_v0  ;;  %927 = vmatpush3.bf16.msra.mxu1 %v1067_v39 }
  0x72   : > { %928 = vmatprep.subr.bf16.mxu1 %v1068_v40 }
  0x74   : > { %424 = vmatpush1.bf16.msra.mxu0 %v1051_v27 }
  0x75   : > { %433 = vmatprep.subr.bf16.mxu0 %v1237_v0  ;;  %929 = vmatpush3.bf16.msra.mxu1 %v1069_v41 }
  0x76   : > { %930 = vmatprep.subr.bf16.mxu1 %v1070_v42 }
  0x78   : > { %434 = vmatpush2.bf16.msra.mxu0 %v1052_v28 }
  0x79   : > { %435 = vmatprep.subr.bf16.mxu0 %v1237_v0  ;;  %931 = vmatpush3.bf16.msra.mxu1 %v1071_v43 }
  0x7a   : > { %947 = vmatprep.subr.bf16.mxu1 %v1239_v44 }
  0x7c   : > { %436 = vmatpush2.bf16.msra.mxu0 %v1053_v29 }
  0x7d   : > { %437 = vmatprep.subr.bf16.mxu0 %v1237_v0 }
  0x80   : > { %438 = vmatpush2.bf16.msra.mxu0 %v1054_v30 }
  0x81   : > { %439 = vmatprep.subr.bf16.mxu0 %v1237_v0  ;;  %v1076_v0 = vld [vmem:[#allocation7 + $0x98] sm:$0xff]  }
  0x84   : > { %440 = vmatpush2.bf16.msra.mxu0 %v1055_v31 }
  0xcb   : > { %v297_v34 = vpop.permute.xlu0 %296 }
  0xcc   : > { %v301_v35 = vsel %vm298_vm3, %v287_v33, %v297_v34 }
  0xcd   : > { %442 = vmatmul.mubr.bf16.vlgmr.msra.gmra.mxu0 %v301_v35 }
 0x18d   : > { %v443_v46 = vpop.f32.mrf.mxu0 }
 0x18e   : > { %v444_v48 = vadd.f32 %v870_v45, %v443_v46 }
 0x18f   : > { %v445_v47 = vpop.f32.mrf.mxu0 }
 0x190   : > { %v450_v52 = vmax.f32 %v444_v48, 0.0 }
 0x191   : > { %v446_v49 = vpop.f32.mrf.mxu0 }
 0x192   : > { %v447_v50 = vadd.f32 %v870_v45, %v446_v49 }
 0x193   : > { %v448_v51 = vpop.f32.mrf.mxu0 }
 0x194   : > { %v451_v53 = vmax.f32 %v447_v50, 0.0 }
 0x196   : > { %v452_v54 = vpack.c.bf16 %v451_v53, %v450_v52 }
 0x198   : > { %v454_v55 = vshrl.u32 %v452_v54, 16  ;;  %697 = vmatprep.mubr.bf16.mxu1 %v452_v54  ;;  %v457_v57 = vshll.u32 %v452_v54, 16 }
 0x19a   : > { %v456_v56 = vrot.slane %v454_v55, 7  ;;  %v462_v3 = vrot.slane %v457_v57, 1 }
 0x19c   : > { %v459_v58 = vor.u32 %v457_v57, %v456_v56  ;;  %v463_v5 = vor.u32 %v462_v3, %v454_v55 }
 0x19e   : > { %v461_v60 = vsel %vm1434_vm6, 0, %v459_v58  ;;  %v465_v6 = vsel %vm1417_vm2, %v463_v5, 0 }
 0x19f   : > { %698 = vmatmul.mubr.bf16.vlgmr.msra.gmra.mxu1 %v461_v60 }
 0x1a0   : > { %948 = vmatpush3.bf16.msra.mxu1 %v1072_v59  ;;  %963 = vmatprep.mubr.msk.bf16.mxu1 %vm1240_vm7, %v1239_v44 }
 0x1a1   : > { %949 = vmatprep.subr.bf16.mxu1 %v1239_v44 }
 0x1a4   : > { %950 = vmatpush3.bf16.msra.mxu1 %v1073_v61 }
 0x1a5   : > { %951 = vmatprep.subr.bf16.mxu1 %v1239_v44 }
 0x1a8   : > { %952 = vmatpush3.bf16.msra.mxu1 %v1074_v62 }
 0x1a9   : > { %953 = vmatprep.subr.bf16.mxu1 %v1239_v44 }
 0x1ac   : > { %954 = vmatpush3.bf16.msra.mxu1 %v1075_v63 }
 0x1ad   : > { %955 = vmatprep.subr.bf16.mxu1 %v1239_v44 }
 0x1b0   : > { %956 = vmatpush3.bf16.msra.mxu1 %v1076_v0 }
 0x1b1   : > { %957 = vmatprep.subr.bf16.mxu1 %v1239_v44 }
 0x1b4   : > { %958 = vmatpush3.bf16.msra.mxu1 %v1077_v1 }
 0x1b5   : > { %959 = vmatprep.subr.bf16.mxu1 %v1239_v44 }
 0x1b8   : > { %960 = vmatpush3.bf16.msra.mxu1 %v1078_v2 }
 0x1b9   : > { %961 = vmatprep.subr.bf16.mxu1 %v1239_v44 }
 0x1bc   : > { %962 = vmatpush3.bf16.msra.mxu1 %v1079_v4 }
 0x1bf   : > { %964 = vmatmul.mubr.bf16.vlgmr.msra.gmra.mxu1 %v465_v6 }
 0x25f   : > { %v932_v7 = vpop.f32.mrf.mxu1 }
 0x261   : > { %v933_v8 = vpop.f32.mrf.mxu1 }
 0x262   : > { %v934_v11 = vadd.f32 %v933_v8, %v932_v7 }
 0x263   : > { %v935_v9 = vpop.f32.mrf.mxu1 }
 0x264   : > { %v700_v15 = vadd.f32 %v934_v11, %v884_v13 }
 0x265   : > { %v936_v12 = vpop.f32.mrf.mxu1 }
 0x266   : > { %v937_v14 = vadd.f32 %v936_v12, %v935_v9 }
 0x268   : > { %v703_v19 = vadd.f32 %v937_v14, %v884_v13 }
 0x27f   : > { %v740_v16 = vpop.f32.mrf.mxu1 }
 0x280   : > { %v741_v17 = vadd.f32 %v740_v16, %v700_v15 }
 0x281   : > { %v965_v10 = vpop.f32.mrf.mxu1 }
 0x282   : > { %v747_v18 = vmax.f32 %v741_v17, 0.0 }
 0x283   : > { %v743_v20 = vpop.f32.mrf.mxu1 }
 0x284   : > { %749 = vst [vmem:[%s271_s12] sm:$0xff] %v747_v18  ;;  %v744_v21 = vadd.f32 %v743_v20, %v703_v19 }
 0x285   : > { %v966_v22 = vpop.f32.mrf.mxu1 }
 0x286   : > { %v748_v23 = vmax.f32 %v744_v21, 0.0 }
 0x288   : > { %750 = vst [vmem:[%s271_s12 + $0x8] sm:$0xff] %v748_v23 }
 0x289   : > { %1173 = shalt.err (!%p1170_p9)
}
 0x28a   : > { %s1174_s26 = scalar_lea.hbm %s1459_s13, 256  ;;  %s1178_s10 = scalar_lea.hbm %s1507_s5, 512 }
 0x28b   : > { %p1175_p13 = scmp.ne.s32.totalorder %s1459_s13, %s1174_s26  ;;  %p1179_p4 = scmp.lt.s32.totalorder %s1459_s13, %s1507_s5 }
 0x28c   : > { %p1180_p8 = scmp.lt.s32.totalorder %s1178_s10, %s1174_s26 }
 0x28d   : > { %p1176_p5 = pnand %p1175_p13, %p1527_p10 }
 0x28e   : > { %p1181_p3 = por %p1180_p8, %p1179_p4 }
 0x28f   : > { %p1177_p0 = pneg %p1176_p5 }
 0x291   : > { %p1182_p11 = pnand %p1181_p3, %p1177_p0 }
 0x293   : > { %1185 = shalt.err (!%p1182_p11)
}
 0x294   : > { %s1242_s6 = smov 128   ;;  %s1243_s7 = smov 8  }
 0x295   : > { %977 = dma.vmem_to_hbm [thread:$0]  (%p1527_p10), %s1454_s28, 256, %s1459_s13, %s752_s14, %s1242_s6, %s1242_s6, %s1243_s7  }
 0x296 PF: > { %s780_s9 = sand.u32 1, %s1216_s18   ;;  %p1528_p1 = scmp.ne.s32.totalorder %s1513_s25, 0 }
 0x297   : > { %p1529_p2 = scmp.ge.s32.totalorder %s1228_s21, 2  ;;  %s781_s17 = scalar_lea.sflag [#allocation4], %s780_s9 }
 0x299   : > { %p991_p6 = pnand %p1529_p2, %p1528_p1 }
 0x29b   : > { %p992_p12 = pneg %p991_p6 }
 0x29d   : > { %1211 = dma.done.wait (%p992_p12), %s781_s17, 256  }
 0x29e   : > { %1213 = vsyncadd (%p992_p12), %s781_s17, 4294967040  ;;  %p19_p7 = scmp.ge.s32.totalorder %s1346_s15, 4   ;;  %s1530_s18 = smov %s1220_s19 }
 0x29f   : > { %s1531_s19 = smov %s1224_s20  ;;  %s1532_s20 = smov %s1362_s27 }
 0x2a0   : > { %s1533_s21 = smov %s1346_s15  ;;  %21 = sbr.rel (!%p19_p7) target bundleno = 6 (0x6), region = 93 }
 0x2a5   :  { %786 = vsyncpa [#allocation3], 1 }
 0x2a6   :  { %788 = vsyncpa [#allocation3 + $0x1], 1 }
 0x2a7   :  { %789 = vsyncpa [#allocation6], 1 }
 0x2a8   :  { %790 = vsyncpa [#allocation4], 1 }
 0x2a9   :  { %792 = vsyncpa [#allocation4 + $0x1], 1 }

</bundles_post_ra>
